<compile_context>
chip_gen: v5e
topology: v5e:2x2
jax: 0.10.0
libtpu: 0.0.40
codegen_flags: <defaults>
</compile_context>

<pallas_src>
import functools

import jax
import jax.numpy as jnp
from jax.experimental import pallas as pl
from jax.experimental.pallas import tpu as pltpu


def _round_up(n, m):
    return ((n + m - 1) // m) * m


def _cdiv(a, b):
    return -(-a // b)


# ----------------------------------------------------------------------------
# Fused kernel: encode + reparameterize + decode for one batch tile.
# ----------------------------------------------------------------------------
def _vae_fused_kernel(x_ref, eps_ref,
                      w_cat_ref, b_cat_ref, w_dec_ref, b_dec_ref,
                      dec_ref, stats_ref, *, z_dim):
    x = x_ref[...]                                                    # (TB, D)

    # Single packed encoder matmul; columns are pre-ordered [mu | logvar | pad].
    h = jnp.dot(x, w_cat_ref[...],
                preferred_element_type=jnp.float32) + b_cat_ref[...]  # (TB, S2)

    # Packed, lane-dense stats straight from the accumulator (unmasked store).
    stats_ref[...] = h.astype(stats_ref.dtype)

    mu = h[:, :z_dim]
    logvar = h[:, z_dim:2 * z_dim]

    # Reparameterize (training mode).  Pure VPU/EUP epilogue, kept in f32
    # (v5e has no bf16 VPU/EUP path).
    std = jnp.exp(0.5 * logvar)
    z = eps_ref[...] * std + mu                                       # stays in VMEM

    # Decoder matmul in the streaming compute dtype (bf16 by default).
    dec = jnp.dot(z.astype(w_dec_ref.dtype), w_dec_ref[...],
                  preferred_element_type=jnp.float32) + b_dec_ref[...]
    dec_ref[...] = dec.astype(dec_ref.dtype)


def _pick_batch_tile(B, max_tile, row_bytes, vmem_budget=12 << 20):
    """Large, balanced, 8-aligned batch tile.

    The kernel is HBM-bandwidth-bound (~27 flop/byte), so bigger tiles win;
    cap so double-buffered per-tile activations stay well under the scoped
    VMEM default on all generations (incl. v7x 64 MiB physical / 32 MiB
    scoped).  Never returns one giant full-array tile for huge B.
    """
    cap = max(8, (vmem_budget // (2 * max(row_bytes, 1))) // 8 * 8)
    max_tile = max(8, min(max_tile, cap))
    b8 = _round_up(max(B, 1), 8)
    nb = _cdiv(b8, max_tile)
    return _round_up(_cdiv(b8, nb), 8)


# ----------------------------------------------------------------------------
# Wrapper
# ----------------------------------------------------------------------------
@functools.partial(jax.jit, static_argnums=(3,),
                   static_argnames=("compute_dtype", "max_batch_tile"))
def vae_forward(x, eps, params, z_dim, *, compute_dtype=jnp.bfloat16,
                max_batch_tile=1024):
    """Returns (dec, mu, logvar) exactly like VAE.forward in training mode."""
    B, D = x.shape
    w_enc, b_enc, w_dec, b_dec = params
    two_z = 2 * z_dim

    # Normalize bias shapes (PyTorch Linear biases are 1-D).
    b_enc = jnp.reshape(b_enc, (1, -1))
    b_dec = jnp.reshape(b_dec, (1, -1))

    # PyTorch semantics: h[:, :z_dim] = logvar, h[:, z_dim:] = mu.
    # Re-order encoder columns so the packed kernel output is [mu | logvar].
    w_cat = jnp.concatenate([w_enc[:, z_dim:two_z], w_enc[:, :z_dim]], axis=1)
    b_cat = jnp.concatenate([b_enc[:, z_dim:two_z], b_enc[:, :z_dim]], axis=1)

    # Lane-density padding for the two output streams (unmasked 128-lane vst).
    S2 = max(_round_up(two_z, 128), 128)
    Dp = max(_round_up(D, 128), 128)
    if S2 > two_z:
        w_cat = jnp.pad(w_cat, ((0, 0), (0, S2 - two_z)))
        b_cat = jnp.pad(b_cat, ((0, 0), (0, S2 - two_z)))
    w_dec_p, b_dec_p = w_dec, b_dec
    if Dp > D:
        w_dec_p = jnp.pad(w_dec_p, ((0, 0), (0, Dp - D)))
        b_dec_p = jnp.pad(b_dec_p, ((0, 0), (0, Dp - D)))

    # dtype plumbing: bf16 streams for the big arrays (x, weights), f32
    # accumulation + f32 epilogue + f32 outputs.  eps stays f32 (epilogue).
    x_c = x.astype(compute_dtype)
    w_cat_c = w_cat.astype(compute_dtype)
    w_dec_c = w_dec_p.astype(compute_dtype)
    b_cat_c = b_cat.astype(jnp.float32)
    b_dec_c = b_dec_p.astype(jnp.float32)
    eps_c = eps.astype(jnp.float32)

    # Batch tiling + ragged-tail padding.
    itemsize = jnp.dtype(compute_dtype).itemsize
    row_bytes = D * itemsize + z_dim * 4 + Dp * 4 + S2 * 4
    tb = _pick_batch_tile(B, max_batch_tile, row_bytes)
    nb = _cdiv(B, tb)
    Bp = nb * tb
    if Bp > B:
        x_c = jnp.pad(x_c, ((0, Bp - B), (0, 0)))
        eps_c = jnp.pad(eps_c, ((0, Bp - B), (0, 0)))

    flops = 2 * Bp * D * S2 + 2 * Bp * z_dim * Dp
    bytes_accessed = (Bp * D * itemsize + Bp * z_dim * 4          # x, eps
                      + D * S2 * itemsize + S2 * 4                # encoder params
                      + z_dim * Dp * itemsize + Dp * 4            # decoder params
                      + Bp * Dp * 4 + Bp * S2 * 4)                # outputs

    kernel = functools.partial(_vae_fused_kernel, z_dim=z_dim)

    dec_out, stats = pl.pallas_call(
        kernel,
        out_shape=(
            jax.ShapeDtypeStruct((Bp, Dp), jnp.float32),      # dec
            jax.ShapeDtypeStruct((Bp, S2), jnp.float32),      # [mu | logvar | pad]
        ),
        grid=(nb,),
        in_specs=[
            pl.BlockSpec((tb, D), lambda b: (b, 0)),          # x        (tiled)
            pl.BlockSpec((tb, z_dim), lambda b: (b, 0)),      # eps      (tiled)
            pl.BlockSpec((D, S2), lambda b: (0, 0)),          # w_cat    (resident)
            pl.BlockSpec((1, S2), lambda b: (0, 0)),          # b_cat    (resident)
            pl.BlockSpec((z_dim, Dp), lambda b: (0, 0)),      # w_dec    (resident)
            pl.BlockSpec((1, Dp), lambda b: (0, 0)),          # b_dec    (resident)
        ],
        out_specs=(
            pl.BlockSpec((tb, Dp), lambda b: (b, 0)),         # dec      (tiled)
            pl.BlockSpec((tb, S2), lambda b: (b, 0)),         # stats    (tiled)
        ),
        compiler_params=pltpu.CompilerParams(
            dimension_semantics=("parallel",),
        ),
        cost_estimate=pl.CostEstimate(
            flops=flops,
            transcendentals=Bp * z_dim,
            bytes_accessed=bytes_accessed,
        ),
    )(x_c, eps_c, w_cat_c, b_cat_c, w_dec_c, b_dec_c)

    dec_final = dec_out[:B, :D]
    mu = stats[:B, :z_dim]
    logvar = stats[:B, z_dim:two_z]
    return dec_final, mu, logvar


# ----------------------------------------------------------------------------
# Pure-JAX reference for sanity checking
# ----------------------------------------------------------------------------
def vae_forward_ref(x, eps, params, z_dim):
    w_enc, b_enc, w_dec, b_dec = params
    h = x @ w_enc + jnp.reshape(b_enc, (1, -1))
    logvar = h[:, :z_dim]
    mu = h[:, z_dim:]
    std = jnp.exp(0.5 * logvar)
    z = eps * std + mu
    dec = z @ w_dec + jnp.reshape(b_dec, (1, -1))
    return dec, mu, logvar


def _make_case(key, B, D, Z, *, bias_1d=False):
    k_x, k_eps, k_we, k_be, k_wd, k_bd = jax.random.split(key, 6)
    x = jax.random.normal(k_x, (B, D), dtype=jnp.float32)
    eps = jax.random.normal(k_eps, (B, Z), dtype=jnp.float32)
    w_enc = jax.random.normal(k_we, (D, 2 * Z), dtype=jnp.float32) * 0.05
    b_enc = jax.random.normal(k_be, (2 * Z,), dtype=jnp.float32) * 0.01
    w_dec = jax.random.normal(k_wd, (Z, D), dtype=jnp.float32) * 0.05
    b_dec = jax.random.normal(k_bd, (D,), dtype=jnp.float32) * 0.01
    if not bias_1d:
        b_enc = b_enc.reshape(1, -1)
        b_dec = b_dec.reshape(1, -1)
    return x, eps, (w_enc, b_enc, w_dec, b_dec)


def _check(B, D, Z, *, compute_dtype, max_batch_tile, atol, rtol, bias_1d, seed):
    x, eps, params = _make_case(jax.random.PRNGKey(seed), B, D, Z, bias_1d=bias_1d)
    dec, mu, logvar = vae_forward(x, eps, params, Z,
                                  compute_dtype=compute_dtype,
                                  max_batch_tile=max_batch_tile)
    jax.block_until_ready((dec, mu, logvar))
    dec_r, mu_r, logvar_r = vae_forward_ref(x, eps, params, Z)
    assert dec.shape == (B, D) and mu.shape == (B, Z) and logvar.shape == (B, Z)
    assert jnp.allclose(dec, dec_r, atol=atol, rtol=rtol), "dec mismatch"
    assert jnp.allclose(mu, mu_r, atol=atol, rtol=rtol), "mu mismatch"
    assert jnp.allclose(logvar, logvar_r, atol=atol, rtol=rtol), "logvar mismatch"


if __name__ == "__main__":
    # 1) Primary shape, bf16 streaming path (default), lane-aligned dims.
    _check(B=16, D=128, Z=64, compute_dtype=jnp.bfloat16, max_batch_tile=1024,
           atol=5e-2, rtol=5e-2, bias_1d=False, seed=0)

    # 2) Non-128 lane dims + ragged batch + 1-D PyTorch-style biases, f32 path
    #    (exercises lane padding of stats/dec and batch padding), tight check.
    _check(B=20, D=64, Z=32, compute_dtype=jnp.float32, max_batch_tile=1024,
           atol=1e-4, rtol=1e-4, bias_1d=True, seed=1)

    # 3) Multi-tile grid with a ragged tail (3 balanced batch tiles), f32 path.
    _check(B=300, D=128, Z=64, compute_dtype=jnp.float32, max_batch_tile=128,
           atol=1e-4, rtol=1e-4, bias_1d=False, seed=2)

    print("KERNEL_OK")
</pallas_src>

<mosaic_0001>
module attributes {stable_mosaic.version = 11 : i64} {
  func.func @_vae_fused_kernel(%arg0: i32, %arg1: memref<16x128xbf16, #tpu.memory_space<vmem>>, %arg2: memref<16x64xf32, #tpu.memory_space<vmem>>, %arg3: memref<128x128xbf16, #tpu.memory_space<vmem>>, %arg4: memref<1x128xf32, #tpu.memory_space<vmem>>, %arg5: memref<64x128xbf16, #tpu.memory_space<vmem>>, %arg6: memref<1x128xf32, #tpu.memory_space<vmem>>, %arg7: memref<16x128xf32, #tpu.memory_space<vmem>>, %arg8: memref<16x128xf32, #tpu.memory_space<vmem>>) attributes {dimension_semantics = [#tpu.dimension_semantics<parallel>], iteration_bounds = array<i64: 1>, scalar_prefetch = 0 : i64, scratch_operands = 0 : i64, tpu.core_type = #tpu.core_type<tc>, window_params = [{transform_indices = @transform_0, window_bounds = array<i64: 16, 128>}, {transform_indices = @transform_1, window_bounds = array<i64: 16, 64>}, {pipeline_mode = #tpu.pipeline_mode<synchronous>, transform_indices = @transform_2, window_bounds = array<i64: 128, 128>}, {pipeline_mode = #tpu.pipeline_mode<synchronous>, transform_indices = @transform_3, window_bounds = array<i64: 1, 128>}, {pipeline_mode = #tpu.pipeline_mode<synchronous>, transform_indices = @transform_4, window_bounds = array<i64: 64, 128>}, {pipeline_mode = #tpu.pipeline_mode<synchronous>, transform_indices = @transform_5, window_bounds = array<i64: 1, 128>}, {transform_indices = @transform_6, window_bounds = array<i64: 16, 128>}, {transform_indices = @transform_7, window_bounds = array<i64: 16, 128>}]} {
    %c0 = arith.constant 0 : index
    %c0_0 = arith.constant 0 : index
    %0 = vector.load %arg1[%c0, %c0_0] : memref<16x128xbf16, #tpu.memory_space<vmem>>, vector<16x128xbf16>
    %c0_1 = arith.constant 0 : index
    %c0_2 = arith.constant 0 : index
    %1 = vector.load %arg3[%c0_1, %c0_2] : memref<128x128xbf16, #tpu.memory_space<vmem>>, vector<128x128xbf16>
    %cst = arith.constant dense<0.000000e+00> : vector<16x128xf32>
    %2 = tpu.matmul %0, %1, %cst {dimension_numbers = #tpu.dot_dimension_numbers<[1], [0], [0], [1], [0, 0, 1, 1], [], []>} : vector<16x128xbf16>, vector<128x128xbf16>, vector<16x128xf32> -> vector<16x128xf32>
    %c0_3 = arith.constant 0 : index
    %c0_4 = arith.constant 0 : index
    %3 = vector.load %arg4[%c0_3, %c0_4] : memref<1x128xf32, #tpu.memory_space<vmem>>, vector<1x128xf32>
    %4 = vector.broadcast %3 : vector<1x128xf32> to vector<16x128xf32>
    %5 = arith.addf %2, %4 : vector<16x128xf32>
    %c0_5 = arith.constant 0 : index
    %c0_6 = arith.constant 0 : index
    %6 = vector.load %arg8[%c0_5, %c0_6] : memref<16x128xf32, #tpu.memory_space<vmem>>, vector<16x128xf32>
    tpu.vector_store %arg8[%c0_5, %c0_6], %5 {strides = array<i32>} : memref<16x128xf32, #tpu.memory_space<vmem>>, vector<16x128xf32>,
    %7 = vector.extract_strided_slice %5 {offsets = [0, 0], sizes = [16, 64], strides = [1, 1]} : vector<16x128xf32> to vector<16x64xf32>
    %8 = vector.extract_strided_slice %5 {offsets = [0, 64], sizes = [16, 64], strides = [1, 1]} : vector<16x128xf32> to vector<16x64xf32>
    %cst_7 = arith.constant 5.000000e-01 : f32
    %9 = vector.broadcast %cst_7 : f32 to vector<16x64xf32>
    %10 = arith.mulf %9, %8 : vector<16x64xf32>
    %11 = math.exp %10 : vector<16x64xf32>
    %c0_8 = arith.constant 0 : index
    %c0_9 = arith.constant 0 : index
    %12 = vector.load %arg2[%c0_8, %c0_9] : memref<16x64xf32, #tpu.memory_space<vmem>>, vector<16x64xf32>
    %13 = arith.mulf %12, %11 : vector<16x64xf32>
    %14 = arith.addf %13, %7 : vector<16x64xf32>
    %15 = arith.truncf %14 : vector<16x64xf32> to vector<16x64xbf16>
    %c0_10 = arith.constant 0 : index
    %c0_11 = arith.constant 0 : index
    %16 = vector.load %arg5[%c0_10, %c0_11] : memref<64x128xbf16, #tpu.memory_space<vmem>>, vector<64x128xbf16>
    %cst_12 = arith.constant dense<0.000000e+00> : vector<16x128xf32>
    %17 = tpu.matmul %15, %16, %cst_12 {dimension_numbers = #tpu.dot_dimension_numbers<[1], [0], [0], [1], [0, 0, 1, 1], [], []>} : vector<16x64xbf16>, vector<64x128xbf16>, vector<16x128xf32> -> vector<16x128xf32>
    %c0_13 = arith.constant 0 : index
    %c0_14 = arith.constant 0 : index
    %18 = vector.load %arg6[%c0_13, %c0_14] : memref<1x128xf32, #tpu.memory_space<vmem>>, vector<1x128xf32>
    %19 = vector.broadcast %18 : vector<1x128xf32> to vector<16x128xf32>
    %20 = arith.addf %17, %19 : vector<16x128xf32>
    %c0_15 = arith.constant 0 : index
    %c0_16 = arith.constant 0 : index
    %21 = vector.load %arg7[%c0_15, %c0_16] : memref<16x128xf32, #tpu.memory_space<vmem>>, vector<16x128xf32>
    tpu.vector_store %arg7[%c0_15, %c0_16], %20 {strides = array<i32>} : memref<16x128xf32, #tpu.memory_space<vmem>>, vector<16x128xf32>,
    return
  }
  func.func @transform_0(%arg0: i32) -> (i32, i32) {
    %c0_i32 = arith.constant 0 : i32
    %c0_i32_0 = arith.constant 0 : i32
    return %arg0, %c0_i32 : i32, i32
  }
  func.func @transform_1(%arg0: i32) -> (i32, i32) {
    %c0_i32 = arith.constant 0 : i32
    %c0_i32_0 = arith.constant 0 : i32
    return %arg0, %c0_i32 : i32, i32
  }
  func.func @transform_2(%arg0: i32) -> (i32, i32) {
    %c0_i32 = arith.constant 0 : i32
    %c0_i32_0 = arith.constant 0 : i32
    %c0_i32_1 = arith.constant 0 : i32
    return %c0_i32, %c0_i32_0 : i32, i32
  }
  func.func @transform_3(%arg0: i32) -> (i32, i32) {
    %c0_i32 = arith.constant 0 : i32
    %c0_i32_0 = arith.constant 0 : i32
    %c0_i32_1 = arith.constant 0 : i32
    return %c0_i32, %c0_i32_0 : i32, i32
  }
  func.func @transform_4(%arg0: i32) -> (i32, i32) {
    %c0_i32 = arith.constant 0 : i32
    %c0_i32_0 = arith.constant 0 : i32
    %c0_i32_1 = arith.constant 0 : i32
    return %c0_i32, %c0_i32_0 : i32, i32
  }
  func.func @transform_5(%arg0: i32) -> (i32, i32) {
    %c0_i32 = arith.constant 0 : i32
    %c0_i32_0 = arith.constant 0 : i32
    %c0_i32_1 = arith.constant 0 : i32
    return %c0_i32, %c0_i32_0 : i32, i32
  }
  func.func @transform_6(%arg0: i32) -> (i32, i32) {
    %c0_i32 = arith.constant 0 : i32
    %c0_i32_0 = arith.constant 0 : i32
    return %arg0, %c0_i32 : i32, i32
  }
  func.func @transform_7(%arg0: i32) -> (i32, i32) {
    %c0_i32 = arith.constant 0 : i32
    %c0_i32_0 = arith.constant 0 : i32
    return %arg0, %c0_i32 : i32, i32
  }
}

</mosaic_0001>

<bundles_post_ra>
// kernel: vae_forward.1
= control target key start
LH: loop header
LB: loop body
LE: loop exit
PB: predicated region body
PF: predicated region fallthrough
CT: control target
= control target key end

     0   :  { %s424_s0 = inlined_call_operand.vmem [shape: bf16[16,128], index: 0, kind: input, shape index: {}]   ;;  %s425_s1 = inlined_call_operand.vmem [shape: f32[16,64], index: 1, kind: input, shape index: {}]   ;;  %s426_s2 = inlined_call_operand.vmem [shape: bf16[128,128], index: 2, kind: input, shape index: {}]   ;;  %s427_s3 = inlined_call_operand.vmem [shape: f32[1,128], index: 3, kind: input, shape index: {}]   ;;  %s428_s4 = inlined_call_operand.vmem [shape: bf16[64,128], index: 4, kind: input, shape index: {}]   ;;  %s429_s5 = inlined_call_operand.vmem [shape: f32[1,128], index: 5, kind: input, shape index: {}]   ;;  %s430_s6 = inlined_call_operand.hbm [shape: f32[16,128], index: 6, kind: output, shape index: {0}]   ;;  %s431_s7 = inlined_call_operand.vmem [shape: f32[16,128], index: 7, kind: output, shape index: {1}]  }
   0x1   :  { %v279_v0 = vld [vmem:[%s426_s2 + $0x38] sm:$0xff]  ;;  %v278_v1 = vld [vmem:[%s426_s2 + $0x30] sm:$0xff] }
   0x2   :  { %103 = vmatpush.bf16.msra.mxu0 %v279_v0 }
   0x3   :  { %13 = vsyncpa [#allocation3], 0  ;;  %v277_v2 = vld [vmem:[%s426_s2 + $0x28] sm:$0xff]  ;;  %v276_v3 = vld [vmem:[%s426_s2 + $0x20] sm:$0xff]  ;;  %s320_s25 = smov 64   ;;  %vm176_vm0 = vcmask 523264  }
   0x4   :  { %v275_v4 = vld [vmem:[%s426_s2 + $0x18] sm:$0xff]  ;;  %v274_v5 = vld [vmem:[%s426_s2 + $0x10] sm:$0xff]  ;;  %v273_v6 = vld [vmem:[%s426_s2 + $0x8] sm:$0xff]  ;;  %s321_s12 = smov [#allocation2]   ;;  %s322_s16 = smov 128  }
   0x5   :  { %v272_v7 = vld [vmem:[%s426_s2] sm:$0xff]  ;;  %v283_v9 = vld [vmem:[%s428_s4 + $0x18] sm:$0xff]  ;;  %v282_v21 = vld [vmem:[%s428_s4 + $0x10] sm:$0xff]  ;;  %s200_s13 = sshll.u32 %s321_s12, 4  ;;  %s323_s17 = smov 8   ;;  %s201_s13 = int_to_ptr.vmem [resolvable:$true] %s200_s13 }
   0x6   :  { %104 = vmatpush.bf16.msra.mxu0 %v278_v1  ;;  %v271_v8 = vld [vmem:[%s424_s0] sm:$0xff]  ;;  %184 = vmatpush.bf16.msra.mxu1 %v283_v9  ;;  %v281_v22 = vld [vmem:[%s428_s4 + $0x8] sm:$0xff] }
   0x7   :  { %v288_v10 = vld [vmem:[%s427_s3] ss:$0 sm:$0xff]  ;;  %v126_v26 = vld [vmem:[%s425_s1 + $0x8] sm:$0xff] }
   0x8   :  { %v280_v23 = vld [vmem:[%s428_s4] sm:$0xff] }
   0x9   :  { %v125_v25 = vld [vmem:[%s425_s1] sm:$0xff]  ;;  %s202_s1 = sshll.u32 %s430_s6, 4  ;;  %s203_s1 = int_to_ptr.hbm [resolvable:$true] %s202_s1 }
   0xa   :  { %105 = vmatpush.bf16.msra.mxu0 %v277_v2  ;;  %185 = vmatpush.bf16.msra.mxu1 %v282_v21  ;;  %v289_v33 = vld [vmem:[%s429_s5] ss:$0 sm:$0xff] }
   0xe   :  { %106 = vmatpush.bf16.msra.mxu0 %v276_v3  ;;  %186 = vmatpush.bf16.msra.mxu1 %v281_v22 }
  0x12   :  { %107 = vmatpush.bf16.msra.mxu0 %v275_v4  ;;  %187 = vmatpush.bf16.msra.mxu1 %v280_v23 }
  0x16   :  { %108 = vmatpush.bf16.msra.mxu0 %v274_v5 }
  0x1a   :  { %109 = vmatpush.bf16.msra.mxu0 %v273_v6 }
  0x1e   :  { %110 = vmatpush.bf16.msra.mxu0 %v272_v7 }
  0x21   :  { %111 = vmatmul.bf16.vlgmr.msra.gmra.mxu0 %v271_v8 }
  0x9e   :  { %v112_v11 = vpop.f32.mrf.mxu0 }
  0x9f   :  { %v113_v12 = vadd.f32 %v288_v10, %v112_v11 }
  0xa1   :  { %117 = vst [vmem:[%s431_s7] sm:$0xff] %v113_v12  ;;  %v119_v13 = vmul.f32 0.5, %v113_v12 }
  0xa3   :  { %v121_v14 = vmul.f32 1.442695, %v119_v13 }
  0xa5   :  { %290 = vpow2.f32 %v121_v14 }
  0xa6   :  { %v114_v15 = vpop.f32.mrf.mxu0 }
  0xa7   :  { %v115_v16 = vadd.f32 %v288_v10, %v114_v15 }
  0xa9   :  { %118 = vst [vmem:[%s431_s7 + $0x8] sm:$0xff] %v115_v16  ;;  %v120_v17 = vmul.f32 0.5, %v115_v16 }
  0xab   :  { %v291_v18 = vpop.eup %290  ;;  %v123_v19 = vmul.f32 1.442695, %v120_v17 }
  0xac   :  { %129 = vrot.lane.b32.xlu0 %v291_v18, %s320_s25 }
  0xad   :  { %292 = vpow2.f32 %v123_v19 }
  0xb3   :  { %v293_v20 = vpop.eup %292 }
  0xb4   :  { %131 = vrot.lane.b32.xlu0 %v293_v20, %s320_s25 }
 0x11e   :  { %v130_v24 = vpop.permute.xlu0 %129 }
 0x11f   :  { %v135_v27 = vmul.f32 %v130_v24, %v125_v25 }
 0x121   :  { %v137_v30 = vadd.f32 %v135_v27, %v113_v12 }
 0x126   :  { %v132_v28 = vpop.permute.xlu0 %131 }
 0x127   :  { %v136_v29 = vmul.f32 %v132_v28, %v126_v26 }
 0x129   :  { %v138_v31 = vadd.f32 %v136_v29, %v115_v16 }
 0x12b   :  { %v139_v32 = vpack.c.bf16 %v138_v31, %v137_v30 }
 0x12d   :  { %270 = vmatmul.msk.bf16.vlgmr.msra.gmra.mxu1 %vm176_vm0, %v139_v32 }
 0x1aa   :  { %v189_v34 = vpop.f32.mrf.mxu1 }
 0x1ab   :  { %v190_v35 = vadd.f32 %v289_v33, %v189_v34 }
 0x1ad   :  { %194 = vst [vmem:[#allocation2] sm:$0xff] %v190_v35 }
 0x1b2   :  { %v191_v36 = vpop.f32.mrf.mxu1 }
 0x1b3   :  { %v192_v37 = vadd.f32 %v289_v33, %v191_v36 }
 0x1b5   :  { %195 = vst [vmem:[#allocation2 + $0x8] sm:$0xff] %v192_v37 }
 0x1b6   :  { %208 = dma.vmem_to_hbm [thread:$0]  %s201_s13, 256, %s203_s1, [#allocation3], %s322_s16, %s322_s16, %s323_s17  }
 0x1b7   :  { %318 = dma.done.wait [#allocation3], 256  }
 0x1b8   :  { %319 = vsyncadd [#allocation3], 4294967040 }
 0x1b9   :  { %217 = vsyncpa [#allocation3], 1 }

</bundles_post_ra>
